<compile_context>
chip_gen: v7x
topology: tpu7x:2x2x1
jax: 0.10.0
libtpu: 0.0.40
codegen_flags: <defaults>
</compile_context>

<pallas_src>
import functools

import jax
import jax.numpy as jnp
from jax import lax
from jax.experimental import pallas as pl
from jax.experimental.pallas import tpu as pltpu

LANE = 128


# ----------------------------- tiling helpers --------------------------------

def _round_up(x, m):
    return ((x + m - 1) // m) * m


def _vmem_budget():
    try:
        cap = int(pltpu.get_tpu_info().vmem_capacity_bytes)
    except Exception:
        cap = 64 * 1024 * 1024          # v7x-safe fallback
    vmem_limit = max(cap - 16 * 1024 * 1024, 32 * 1024 * 1024)
    return vmem_limit


def _choose_tiling(n, fhid_p, fout_p):
    """Adjacency row tile TM, padded node count, and vmem_limit_bytes.

    Sizes the ENTIRE fused-kernel working set against a budget derived from the
    device's actual VMEM capacity (not a flat constant): double-buffered bf16
    adjacency tiles, resident bf16 XW1 input, M2/H2 scratch panels, output
    tiles and weights.  Picks the largest row tile that fits (bigger tiles ->
    closer to the HBM roofline, fewer grid-step overheads).
    """
    vmem_limit = _vmem_budget()
    budget = int(vmem_limit * 0.85)
    n128 = _round_up(max(n, 1), LANE)        # lane-dense contraction dim
    for tm in (2048, 1024, 512, 256, 128):
        if tm > n128:
            continue
        n_pad = _round_up(n128, tm)
        ws = (2 * tm * n_pad * 2              # double-buffered bf16 Â row tiles
              + 2 * n_pad * fhid_p * 2        # resident bf16 XW1 (double-buffered)
              + n_pad * fout_p * 2            # M2 scratch (bf16)
              + n_pad * fout_p * 4            # H2 scratch (f32)
              + 2 * tm * fout_p * 4           # double-buffered f32 output tiles
              + 2 * (fhid_p * fout_p * 2 + (fhid_p + fout_p) * 4))  # weights/bias
        if ws <= budget:
            return tm, n_pad, vmem_limit
    return 128, _round_up(n128, 128), vmem_limit


# ----------------------------- Pallas kernels --------------------------------

def _xw_kernel(x_ref, w_ref, o_ref):
    # One row tile of X @ W (f32 MXU), emitted in bf16 for downstream passes.
    o_ref[0] = jnp.dot(x_ref[0], w_ref[...],
                       preferred_element_type=jnp.float32).astype(o_ref.dtype)


def xw_pair(x_pair, w, *, tm, vmem_limit):
    _, n_pad, fin_p = x_pair.shape
    fo_p = w.shape[1]
    n_tiles = n_pad // tm
    return pl.pallas_call(
        _xw_kernel,
        out_shape=jax.ShapeDtypeStruct((2, n_pad, fo_p), jnp.bfloat16),
        grid_spec=pltpu.PrefetchScalarGridSpec(
            num_scalar_prefetch=0,
            grid=(2, n_tiles),
            in_specs=[
                pl.BlockSpec((1, tm, fin_p), lambda v, i: (v, i, 0)),
                pl.BlockSpec((fin_p, fo_p), lambda v, i: (0, 0)),
            ],
            out_specs=pl.BlockSpec((1, tm, fo_p), lambda v, i: (v, i, 0)),
        ),
        compiler_params=pltpu.CompilerParams(
            dimension_semantics=("parallel", "arbitrary"),
            vmem_limit_bytes=vmem_limit,
        ),
    )(x_pair, w)


def _fused_kernel(xw_ref, adj_ref, w2_ref, b1_ref, b2_ref, o_ref,
                  m2_ref, h2_ref, sum_ref, ssq_ref, *, n_real, eps):
    # grid = (view, pass, row_tile); pass 0 = layer1 (+ incremental M2),
    # pass 1 = layer2 into resident VMEM + masked column stats,
    # pass 2 = standardize straight out of VMEM.
    p = pl.program_id(1)
    i = pl.program_id(2)
    tm = adj_ref.shape[1]
    row0 = pl.multiple_of(i * tm, tm)

    @pl.when(p == 0)
    def _():
        # Layer 1 on this Â row tile.  M2 = H1 @ W2 is built incrementally, so
        # no full H1 scratch and no serial end-of-pass matmul bubble.
        h1 = jnp.maximum(
            jnp.dot(adj_ref[0], xw_ref[0],
                    preferred_element_type=jnp.float32) + b1_ref[...],
            0.0)
        m2_ref[pl.ds(row0, tm), :] = jnp.dot(
            h1.astype(jnp.bfloat16), w2_ref[...],
            preferred_element_type=jnp.float32).astype(jnp.bfloat16)

    @pl.when(jnp.logical_and(p == 1, i == 0))
    def _():
        sum_ref[...] = jnp.zeros_like(sum_ref)
        ssq_ref[...] = jnp.zeros_like(ssq_ref)

    @pl.when(p == 1)
    def _():
        # Layer 2 row tile kept resident in VMEM (no HBM round trip) + masked
        # per-column statistics over the real rows only (padded rows hold b2).
        h2 = jnp.dot(adj_ref[0], m2_ref[...],
                     preferred_element_type=jnp.float32) + b2_ref[...]
        h2_ref[pl.ds(row0, tm), :] = h2
        gid = row0 + lax.broadcasted_iota(jnp.int32, (tm, 1), 0)
        h2m = jnp.where(gid < n_real, h2, 0.0)
        sum_ref[...] += jnp.sum(h2m, axis=0, keepdims=True)
        ssq_ref[...] += jnp.sum(h2m * h2m, axis=0, keepdims=True)

    @pl.when(p == 2)
    def _():
        # z = (h - mean) / std, ddof=1 (torch.std default).  rsqrt -> EUP slot;
        # eps guard keeps padded/constant columns finite (sliced away outside).
        inv_n = 1.0 / n_real
        mean = sum_ref[...] * inv_n
        var = (ssq_ref[...] - n_real * mean * mean) * (1.0 / max(n_real - 1, 1))
        inv_std = lax.rsqrt(jnp.maximum(var, eps))
        o_ref[0] = (h2_ref[pl.ds(row0, tm), :] - mean) * inv_std


def fused_forward(xw1, adj_pair, b1, w2_bf16, b2, *, tm, n_real, vmem_limit,
                  eps=1e-12):
    _, n_pad, fhid_p = xw1.shape
    fout_p = w2_bf16.shape[1]
    n_tiles = n_pad // tm

    def adj_index(v, p, i):
        # Pin the adjacency block during the normalize pass (p == 2) so no
        # extra Â tiles are DMA'd for a pass that never reads them.
        sel = p // 2
        return (v, i * (1 - sel) + (n_tiles - 1) * sel, 0)

    def out_index(v, p, i):
        # Passes 0/1 never write o_ref and keep the output block index pinned
        # at (v, 0, 0); Pallas only writes an output block back when its block
        # index changes (or at the end), so no stale writeback occurs.  Pass 2
        # writes each (v, i) tile exactly once.
        return (v, i * (p // 2), 0)

    return pl.pallas_call(
        functools.partial(_fused_kernel, n_real=n_real, eps=eps),
        out_shape=jax.ShapeDtypeStruct((2, n_pad, fout_p), jnp.float32),
        grid_spec=pltpu.PrefetchScalarGridSpec(
            num_scalar_prefetch=0,
            grid=(2, 3, n_tiles),
            in_specs=[
                pl.BlockSpec((1, n_pad, fhid_p), lambda v, p, i: (v, 0, 0)),
                pl.BlockSpec((1, tm, n_pad), adj_index),
                pl.BlockSpec((fhid_p, fout_p), lambda v, p, i: (0, 0)),
                pl.BlockSpec((1, fhid_p), lambda v, p, i: (0, 0)),
                pl.BlockSpec((1, fout_p), lambda v, p, i: (0, 0)),
            ],
            out_specs=pl.BlockSpec((1, tm, fout_p), out_index),
            scratch_shapes=[
                pltpu.VMEM((n_pad, fout_p), jnp.bfloat16),   # M2 = H1 @ W2
                pltpu.VMEM((n_pad, fout_p), jnp.float32),    # H2 (layer-2 out)
                pltpu.VMEM((1, fout_p), jnp.float32),        # column sum
                pltpu.VMEM((1, fout_p), jnp.float32),        # column sum-of-squares
            ],
        ),
        compiler_params=pltpu.CompilerParams(
            dimension_semantics=("parallel", "arbitrary", "arbitrary"),
            vmem_limit_bytes=vmem_limit,
        ),
    )(xw1, adj_pair, w2_bf16, b1, b2)


def _conv_kernel(xw_ref, adj_ref, b_ref, o_ref, *, apply_relu):
    # Single GCN layer (fallback path): Â row tile @ resident XW + bias.
    out = jnp.dot(adj_ref[0], xw_ref[0],
                  preferred_element_type=jnp.float32) + b_ref[...]
    if apply_relu:
        out = jnp.maximum(out, 0.0)
    o_ref[0] = out


def gcn_conv_pair(xw_bf16, adj_pair, b, *, apply_relu, tm, vmem_limit):
    _, n_pad, fo_p = xw_bf16.shape
    n_tiles = n_pad // tm
    return pl.pallas_call(
        functools.partial(_conv_kernel, apply_relu=apply_relu),
        out_shape=jax.ShapeDtypeStruct((2, n_pad, fo_p), jnp.float32),
        grid_spec=pltpu.PrefetchScalarGridSpec(
            num_scalar_prefetch=0,
            grid=(2, n_tiles),
            in_specs=[
                pl.BlockSpec((1, n_pad, fo_p), lambda v, i: (v, 0, 0)),
                pl.BlockSpec((1, tm, n_pad), lambda v, i: (v, i, 0)),
                pl.BlockSpec((1, fo_p), lambda v, i: (0, 0)),
            ],
            out_specs=pl.BlockSpec((1, tm, fo_p), lambda v, i: (v, i, 0)),
        ),
        compiler_params=pltpu.CompilerParams(
            dimension_semantics=("parallel", "arbitrary"),
            vmem_limit_bytes=vmem_limit,
        ),
    )(xw_bf16, adj_pair, b)


def _standardize_kernel(h_ref, o_ref, *, eps):
    # z = (h - h.mean(0)) / h.std(0); torch.std default is unbiased (ddof=1).
    h = h_ref[0]
    n = h.shape[0]
    mean = jnp.sum(h, axis=0, keepdims=True) * (1.0 / n)
    c = h - mean
    var = jnp.sum(c * c, axis=0, keepdims=True) * (1.0 / max(n - 1, 1))
    o_ref[0] = c * lax.rsqrt(jnp.maximum(var, eps))


def standardize_pair(h_pair, eps=1e-12):
    # TODO(synk): whole-view standardize used only by the >2-layer fallback; the
    # default 2-layer path fuses the stats/normalize into the main kernel.
    _, n, f = h_pair.shape
    return pl.pallas_call(
        functools.partial(_standardize_kernel, eps=eps),
        out_shape=jax.ShapeDtypeStruct((2, n, f), jnp.float32),
        grid_spec=pltpu.PrefetchScalarGridSpec(
            num_scalar_prefetch=0,
            grid=(2,),
            in_specs=[pl.BlockSpec((1, n, f), lambda v: (v, 0, 0))],
            out_specs=pl.BlockSpec((1, n, f), lambda v: (v, 0, 0)),
        ),
        compiler_params=pltpu.CompilerParams(
            dimension_semantics=("parallel",)),
    )(h_pair)


# ----------------------------- JAX glue ---------------------------------------

def normalized_adjacency(edge_index, num_nodes):
    # Â = D^{-1/2} (A + I) D^{-1/2}   (matches torch_geometric GCNConv gcn_norm)
    # TODO(synk): sparse scatter of edge_index into dense adjacency stays in JAX glue.
    src, dst = edge_index[0], edge_index[1]
    a = jnp.zeros((num_nodes, num_nodes), jnp.float32)
    a = a.at[dst, src].add(1.0)                     # duplicate edges accumulate
    a = a + jnp.eye(num_nodes, dtype=jnp.float32)   # self loops
    deg = jnp.sum(a, axis=1)
    d_inv_sqrt = jnp.where(deg > 0, lax.rsqrt(deg), 0.0)
    return a * d_inv_sqrt[:, None] * d_inv_sqrt[None, :]


def _pad_params(params):
    padded = []
    for w, b in params:
        fi, fo = w.shape
        fi_p, fo_p = _round_up(fi, LANE), _round_up(fo, LANE)
        w_p = jnp.zeros((fi_p, fo_p), jnp.float32).at[:fi, :fo].set(w)
        b_p = jnp.zeros((1, fo_p), jnp.float32).at[0, :fo].set(b)
        padded.append((w_p, b_p))
    return padded


def clgr_forward(x1, edge_index1, x2, edge_index2, params):
    n, fin = x1.shape
    fout = params[-1][0].shape[1]
    fin_p = _round_up(fin, LANE)
    fhid_p = _round_up(params[0][0].shape[1], LANE)
    fout_p = _round_up(fout, LANE)

    tm, n_pad, vmem_limit = _choose_tiling(n, fhid_p, fout_p)

    adj1 = normalized_adjacency(edge_index1, n)
    adj2 = normalized_adjacency(edge_index2, n)

    x_pair = jnp.zeros((2, n_pad, fin_p), jnp.float32)
    x_pair = x_pair.at[0, :n, :fin].set(x1).at[1, :n, :fin].set(x2)
    # bf16 adjacency: halves the dominant HBM stream, feeds the MXU natively.
    adj_pair = jnp.zeros((2, n_pad, n_pad), jnp.bfloat16)
    adj_pair = adj_pair.at[0, :n, :n].set(adj1.astype(jnp.bfloat16))
    adj_pair = adj_pair.at[1, :n, :n].set(adj2.astype(jnp.bfloat16))

    params_p = _pad_params(params)

    if len(params_p) == 2:
        (w1, b1), (w2, b2) = params_p
        xw1 = xw_pair(x_pair, w1, tm=tm, vmem_limit=vmem_limit)      # bf16
        z_pair = fused_forward(xw1, adj_pair, b1, w2.astype(jnp.bfloat16), b2,
                               tm=tm, n_real=n, vmem_limit=vmem_limit)
        z = z_pair[:, :n, :fout]
        return z[0], z[1]

    # Generic (n_layers != 2) fallback: per-layer XW precompute + tiled conv.
    h_pair = x_pair
    for li, (w, b) in enumerate(params_p):
        xw = xw_pair(h_pair, w, tm=tm, vmem_limit=vmem_limit)
        h_pair = gcn_conv_pair(xw, adj_pair, b,
                               apply_relu=(li < len(params_p) - 1),
                               tm=tm, vmem_limit=vmem_limit)
    z_pair = standardize_pair(h_pair[:, :n, :])
    z = z_pair[:, :, :fout]
    return z[0], z[1]


def init_gcn_params(key, in_dim, hid_dim, out_dim, n_layers):
    if n_layers > 1:
        dims = [in_dim] + [hid_dim] * (n_layers - 1) + [out_dim]
    else:
        dims = [in_dim, out_dim]
    params = []
    for i in range(len(dims) - 1):
        key, wk = jax.random.split(key)
        fan_in, fan_out = dims[i], dims[i + 1]
        limit = jnp.sqrt(6.0 / (fan_in + fan_out))            # glorot uniform
        w = jax.random.uniform(wk, (fan_in, fan_out), jnp.float32, -limit, limit)
        b = jnp.zeros((fan_out,), jnp.float32)
        params.append((w, b))
    return params


def make_edge_index(key, num_nodes, num_edges):
    k1, k2 = jax.random.split(key)
    src = jax.random.randint(k1, (num_edges,), 0, num_nodes)
    off = jax.random.randint(k2, (num_edges,), 1, num_nodes)
    dst = (src + off) % num_nodes                              # no self loops
    return jnp.stack([jnp.concatenate([src, dst]),
                      jnp.concatenate([dst, src])]).astype(jnp.int32)


def _reference_forward(x1, e1, x2, e2, params):
    # Pure-JAX (f32) reference for correctness checking.
    def gcn(x, adj):
        h = x
        for li, (w, b) in enumerate(params):
            h = adj @ (h @ w) + b
            if li < len(params) - 1:
                h = jnp.maximum(h, 0.0)
        return h

    def std(h):
        m = jnp.mean(h, axis=0, keepdims=True)
        c = h - m
        v = jnp.sum(c * c, axis=0, keepdims=True) / max(h.shape[0] - 1, 1)
        return c / jnp.sqrt(v)

    n = x1.shape[0]
    adj1 = normalized_adjacency(e1, n)
    adj2 = normalized_adjacency(e2, n)
    return std(gcn(x1, adj1)), std(gcn(x2, adj2))


# ----------------------------- main --------------------------------------------

if __name__ == "__main__":
    N, IN_DIM, HID_DIM, OUT_DIM, N_LAYERS = 16, 8, 32, 16, 2
    TAU = 0.5  # CLGR.tau is unused in forward()
    E = 32

    key = jax.random.PRNGKey(0)
    kx1, kx2, ke1, ke2, kp = jax.random.split(key, 5)

    x1 = jax.random.normal(kx1, (N, IN_DIM), jnp.float32)
    x2 = jax.random.normal(kx2, (N, IN_DIM), jnp.float32)
    edge_index1 = make_edge_index(ke1, N, E)
    edge_index2 = make_edge_index(ke2, N, E)
    params = init_gcn_params(kp, IN_DIM, HID_DIM, OUT_DIM, N_LAYERS)

    # fused 2-layer path (CLGR default)
    z1, z2 = clgr_forward(x1, edge_index1, x2, edge_index2, params)
    jax.block_until_ready((z1, z2))
    assert z1.shape == (N, OUT_DIM) and z2.shape == (N, OUT_DIM)
    assert bool(jnp.all(jnp.isfinite(z1))) and bool(jnp.all(jnp.isfinite(z2)))
    r1, r2 = _reference_forward(x1, edge_index1, x2, edge_index2, params)
    assert bool(jnp.allclose(z1, r1, rtol=5e-2, atol=5e-2))
    assert bool(jnp.allclose(z2, r2, rtol=5e-2, atol=5e-2))

    # per-layer fallback path (n_layers != 2)
    params3 = init_gcn_params(kp, IN_DIM, HID_DIM, OUT_DIM, 3)
    z1b, z2b = clgr_forward(x1, edge_index1, x2, edge_index2, params3)
    jax.block_until_ready((z1b, z2b))
    r1b, r2b = _reference_forward(x1, edge_index1, x2, edge_index2, params3)
    assert bool(jnp.allclose(z1b, r1b, rtol=5e-2, atol=5e-2))
    assert bool(jnp.allclose(z2b, r2b, rtol=5e-2, atol=5e-2))

    print("KERNEL_OK")
</pallas_src>

<mosaic_0001>
module attributes {stable_mosaic.version = 11 : i64} {
  func.func @_xw_kernel(%arg0: i32, %arg1: i32, %arg2: memref<1x128x128xf32, #tpu.memory_space<vmem>>, %arg3: memref<128x128xf32, #tpu.memory_space<vmem>>, %arg4: memref<1x128x128xbf16, #tpu.memory_space<vmem>>) attributes {dimension_semantics = [#tpu.dimension_semantics<parallel>, #tpu.dimension_semantics<arbitrary>], iteration_bounds = array<i64: 2, 1>, scalar_prefetch = 0 : i64, scratch_operands = 0 : i64, tpu.core_type = #tpu.core_type<tc>, window_params = [{transform_indices = @transform_0, window_bounds = array<i64: 1, 128, 128>}, {pipeline_mode = #tpu.pipeline_mode<synchronous>, transform_indices = @transform_1, window_bounds = array<i64: 128, 128>}, {transform_indices = @transform_2, window_bounds = array<i64: 1, 128, 128>}]} {
    %c0 = arith.constant 0 : index
    %c0_0 = arith.constant 0 : index
    %c0_1 = arith.constant 0 : index
    %0 = vector.load %arg2[%c0, %c0_0, %c0_1] : memref<1x128x128xf32, #tpu.memory_space<vmem>>, vector<1x128x128xf32>
    %1 = vector.shape_cast %0 : vector<1x128x128xf32> to vector<128x128xf32>
    %c0_2 = arith.constant 0 : index
    %c0_3 = arith.constant 0 : index
    %2 = vector.load %arg3[%c0_2, %c0_3] : memref<128x128xf32, #tpu.memory_space<vmem>>, vector<128x128xf32>
    %cst = arith.constant dense<0.000000e+00> : vector<128x128xf32>
    %3 = tpu.matmul %1, %2, %cst {dimension_numbers = #tpu.dot_dimension_numbers<[1], [0], [0], [1], [0, 0, 1, 1], [], []>} : vector<128x128xf32>, vector<128x128xf32>, vector<128x128xf32> -> vector<128x128xf32>
    %4 = arith.truncf %3 : vector<128x128xf32> to vector<128x128xbf16>
    %c0_4 = arith.constant 0 : index
    %c0_5 = arith.constant 0 : index
    %c0_6 = arith.constant 0 : index
    %5 = vector.load %arg4[%c0_4, %c0_5, %c0_6] : memref<1x128x128xbf16, #tpu.memory_space<vmem>>, vector<1x128x128xbf16>
    %6 = vector.shape_cast %5 : vector<1x128x128xbf16> to vector<128x128xbf16>
    %7 = vector.shape_cast %4 : vector<128x128xbf16> to vector<1x128x128xbf16>
    tpu.vector_store %arg4[%c0_4, %c0_5, %c0_6], %7 {strides = array<i32>} : memref<1x128x128xbf16, #tpu.memory_space<vmem>>, vector<1x128x128xbf16>,
    return
  }
  func.func @transform_0(%arg0: i32, %arg1: i32) -> (i32, i32, i32) {
    %c0_i32 = arith.constant 0 : i32
    %c0_i32_0 = arith.constant 0 : i32
    return %arg0, %arg1, %c0_i32 : i32, i32, i32
  }
  func.func @transform_1(%arg0: i32, %arg1: i32) -> (i32, i32) {
    %c0_i32 = arith.constant 0 : i32
    %c0_i32_0 = arith.constant 0 : i32
    %c0_i32_1 = arith.constant 0 : i32
    return %c0_i32, %c0_i32_0 : i32, i32
  }
  func.func @transform_2(%arg0: i32, %arg1: i32) -> (i32, i32, i32) {
    %c0_i32 = arith.constant 0 : i32
    %c0_i32_0 = arith.constant 0 : i32
    return %arg0, %arg1, %c0_i32 : i32, i32, i32
  }
}

</mosaic_0001>

<bundles_post_ra>
// kernel: tpu_custom_call.1
= control target key start
LH: loop header
LB: loop body
LE: loop exit
PB: predicated region body
PF: predicated region fallthrough
CT: control target
= control target key end

     0   :  { %7 = vsyncpa [#allocation3], 0  ;;  %s1290_s0 = inlined_call_operand.hbm [shape: f32[2,128,128], index: 0, kind: input, shape index: {}]   ;;  %s1291_s1 = inlined_call_operand.hbm [shape: f32[128,128], index: 1, kind: input, shape index: {}]   ;;  %s1292_s2 = inlined_call_operand.hbm [shape: bf16[2,128,128], index: 2, kind: output, shape index: {}]  }
   0x1   :  { %9 = vsyncpa [#allocation3 + $0x1], 0 }
   0x2   :  { %10 = vsyncpa [#allocation6], 0 }
   0x3   :  { %11 = vsyncpa [#allocation4], 0 }
   0x4   :  { %13 = vsyncpa [#allocation4 + $0x1], 0  ;;  %s1046_s9 = smov 0   ;;  %s1048_s10 = smov 0  }
   0x5   :  { %s1050_s11 = smov 0   ;;  %s1052_s12 = smov 0  }
   0x6   :  { %s1054_s13 = smov 0   ;;  %s1056_s14 = smov 0  }
   0x7 LB: > { %s567_s15 = sadd.s32 4294967295, %s1022_s14   ;;  %s568_s16 = sadd.s32 4294967294, %s1022_s14   ;;  %s1022_s14 = sphi %s1056_s14, %s19_s14   ;;  %s1018_s13 = sphi %s1054_s13, %s1316_s13   ;;  %s1014_s12 = sphi %s1052_s12, %s1315_s12   ;;  %s1010_s11 = sphi %s1050_s11, %s1314_s11   ;;  %s1006_s10 = sphi %s1048_s10, %s1313_s10   ;;  %s1002_s9 = sphi %s1046_s9, %s1312_s9  }
   0x8   : > { %p53_p0 = scmp.ne.s32.totalorder %s1006_s10, %s1002_s9  ;;  %p1080_p1 = scmp.eq.s32.totalorder %s567_s15, 0 }
   0x9   : > { %p1084_p2 = scmp.eq.s32.totalorder %s567_s15, 1  ;;  %p106_p3 = scmp.eq.s32.totalorder %s568_s16, 1 }
   0xa   : > { %s1297_s17 = scalar_select %p1080_p1, 1, 0 }
   0xb   : > { %s1298_s18 = scalar_select %p1084_p2, 1, 0 }
   0xc   : > { %p1090_p4 = por %p1080_p1, %p53_p0  ;;  %p569_p5 = scmp.ge.s32.totalorder %s1022_s14, 1 }
   0xd   : > { %p1095_p6 = por %p106_p3, %p53_p0  ;;  %p113_p7 = scmp.lt.s32.totalorder %s1022_s14, 3 }
   0xe   : > { %s1299_s19 = scalar_select %p1090_p4, 1, 0 }
   0xf   : > { %s1300_s20 = scalar_select %p1095_p6, 1, 0 }
  0x10   : > { %p1100_p8 = pnand %p569_p5, %p113_p7  ;;  %s1024_s22 = smov [#allocation5]  }
  0x11   : > { %s125_s23 = sshll.u32 %s1024_s22, 4  ;;  %s31_s25 = sadd.s32 1, %s1018_s13  ;;  %s126_s23 = int_to_ptr.vmem [resolvable:$true] %s125_s23 }
  0x12   : > { %s1301_s21 = scalar_select %p1100_p8, 1, 0 }
  0x13   : > { %p809_p9 = pneg %p1100_p8  ;;  %s878_s28 = scalar_lea.hbm %s1291_s1, 2048 }
  0x14   : > { %p879_p12 = scmp.ne.s32.totalorder %s1291_s1, %s878_s28  ;;  %p885_p5 = scmp.lt.u32.totalorder %s878_s28, %s1291_s1 }
  0x15   : > { %p1109_p11 = pnand %p809_p9, %p1080_p1 }
  0x17   : > { %p880_p13 = pneg %p1109_p11 }
  0x19   : > { %p881_p0 = pnand %p880_p13, %p879_p12 }
  0x1b   : > { %p882_p3 = pneg %p881_p0 }
  0x1d   : > { %p887_p7 = pnand %p885_p5, %p882_p3 }
  0x1f   : > { %890 = shalt.err (!%p887_p7)
}
  0x20   : > { %s891_s5 = scalar_lea.vmem %s126_s23, 2048  ;;  %p899_p1 = scmp.lt.s32.totalorder %s126_s23, %s126_s23 }
  0x21   : > { %p892_p9 = scmp.ne.s32.totalorder %s126_s23, %s891_s5  ;;  %p900_p4 = scmp.lt.s32.totalorder %s891_s5, %s891_s5 }
  0x23   : > { %p894_p10 = pnand %p892_p9, %p880_p13  ;;  %p901_p8 = por %p900_p4, %p899_p1 }
  0x25   : > { %p895_p6 = pneg %p894_p10 }
  0x27   : > { %p902_p2 = pnand %p901_p8, %p895_p6 }
  0x29   : > { %905 = shalt.err (!%p902_p2)
}
  0x2a   : > { %s1025_s6 = smov 128   ;;  %s1026_s7 = smov 8  }
  0x2b   : > { %812 = dma.hbm_to_vmem [thread:$0]  (!%p1109_p11), %s1291_s1, 2048, %s126_s23, [#allocation6], %s1025_s6, %s1025_s6, %s1026_s7  }
  0x2c   : > { %p33_p1 = scmp.ge.s32.totalorder %s31_s25, 2  ;;  %s40_s16 = sadd.s32 1, %s1010_s11 }
  0x2d   : > { %p47_p2 = scmp.ne.s32.totalorder %s1010_s11, %s1006_s10  ;;  %p48_p4 = scmp.eq.s32.totalorder %s1022_s14, 0 }
  0x2e   : > { %s1318_s25 = smov (%p33_p1, %s31_s25), 0  ;;  %p1304_p8 = scmp.ne.s32.totalorder %s1298_s18, 0 }
  0x2f   : > { %p1139_p6 = por %p48_p4, %p47_p2  ;;  %s35_s26 = ssub.s32 %s1018_s13, %s1318_s25 }
  0x30   : > { %p1145_p10 = por %p1304_p8, %p47_p2  ;;  %p822_p12 = scmp.lt.s32.totalorder %s1022_s14, 2 }
  0x31   : > { %p38_p11 = scmp.eq.s32.totalorder %s35_s26, 0  ;;  %s139_s23 = sand.u32 1, %s1010_s11  }
  0x32   : > { %s572_s27 = sshll.u32 %s139_s23, 7  ;;  %s600_s29 = sshll.u32 %s1018_s13, 11 }
  0x33   : > { %s1154_s28 = scalar_select %p38_p11, %s1010_s11, %s40_s16  }
  0x34   : > { %s1160_s4 = scalar_lea.hbm %s1290_s0, %s600_s29  ;;  %s143_s18 = scalar_lea.vmem [#allocation2], %s572_s27 }
  0x35   : > { %s152_s5 = sshll.u32 %s143_s18, 4  ;;  %p1166_p13 = pnand %p822_p12, %p1139_p6  ;;  %s1162_s5 = int_to_ptr.vmem [resolvable:$true] %s152_s5 }
  0x36   : > { %s1170_s15 = scalar_lea.sflag [#allocation3], %s139_s23  ;;  %s906_s16 = scalar_lea.hbm %s1160_s4, 2048 }
  0x37   : > { %p907_p0 = scmp.ne.s32.totalorder %s1160_s4, %s906_s16  ;;  %p908_p3 = pneg %p1166_p13 }
  0x38   : > { %s911_s22 = scalar_lea.hbm %s1290_s0, 4096  ;;  %p912_p9 = scmp.lt.u32.totalorder %s1160_s4, %s1290_s0 }
  0x39   : > { %p909_p5 = pnand %p908_p3, %p907_p0  ;;  %p913_p1 = scmp.lt.u32.totalorder %s911_s22, %s906_s16 }
  0x3a   : > { %p915_p4 = scmp.lt.u32.totalorder %s906_s16, %s1160_s4 }
  0x3b   : > { %p910_p7 = pneg %p909_p5  ;;  %p914_p2 = por %p913_p1, %p912_p9 }
  0x3d   : > { %p916_p6 = por %p915_p4, %p914_p2 }
  0x3f   : > { %p917_p8 = pnand %p916_p6, %p910_p7 }
  0x41   : > { %920 = shalt.err (!%p917_p8)
}
  0x42   : > { %s921_s23 = scalar_lea.vmem %s1162_s5, 2048  ;;  %s1027_s3 = smov [#allocation2]  }
  0x43   : > { %p922_p12 = scmp.ne.s32.totalorder %s1162_s5, %s921_s23  ;;  %s926_s18 = sshll.u32 %s1027_s3, 4  ;;  %s927_s18 = int_to_ptr.vmem [resolvable:$false] %s926_s18 }
  0x44   : > { %s928_s26 = scalar_lea.vmem %s927_s18, 4096  ;;  %p929_p5 = scmp.lt.s32.totalorder %s1162_s5, %s927_s18 }
  0x45   : > { %p924_p11 = pnand %p922_p12, %p908_p3  ;;  %p930_p9 = scmp.lt.s32.totalorder %s928_s26, %s921_s23 }
  0x47   : > { %p925_p0 = pneg %p924_p11  ;;  %p931_p1 = por %p930_p9, %p929_p5 }
  0x49   : > { %p932_p2 = pnand %p931_p1, %p925_p0 }
  0x4b   : > { %935 = shalt.err (!%p932_p2)
}
  0x4c   : > { %816 = dma.hbm_to_vmem [thread:$0]  (!%p1166_p13), %s1160_s4, 2048, %s1162_s5, %s1170_s15, %s1025_s6, %s1025_s6, %s1026_s7  }
  0x4d   : > { %p1307_p3 = scmp.ne.s32.totalorder %s1301_s21, 0 }
  0x4e   : > { %s1204_s16 = sand.u32 (!%p1307_p3), 1, %s1006_s10   ;;  %p1308_p7 = scmp.ne.s32.totalorder (!%p1307_p3), %s1299_s19, 0 }
  0x4f   : > { %164 = sbr.rel (%p1307_p3) target bundleno = 367 (0x16f), region = 28  ;;  %s576_s27 = sshll.u32 (!%p1307_p3), %s1204_s16, 7 }
  0x50   : > { %s167_s22 = scalar_lea.sflag (!%p1307_p3), [#allocation3], %s1204_s16  ;;  %s1208_s29 = scalar_lea.vmem (!%p1307_p3), [#allocation2], %s576_s27 }
  0x56   : > { %989 = dma.done.wait (%p1308_p7), %s167_s22, 2048  }
  0x57   : > { %991 = vsyncadd (%p1308_p7), %s167_s22, 4294965248  ;;  %p1309_p13 = scmp.ne.s32.totalorder %s1297_s17, 0 }
  0x59   : > { %993 = dma.done.wait (%p1309_p13), [#allocation6], 2048  }
  0x5a   : > { %995 = vsyncadd (%p1309_p13), [#allocation6], 4294965248  ;;  %v213_v0 = vld [vmem:[#allocation5] sm:$0xff]  ;;  %v214_v1 = vld [vmem:[#allocation5 + $0x8] sm:$0xff]  ;;  %s578_s17 = sshll.u32 %s1204_s16, 6  ;;  %s617_s6 = sshll.u32 %s1014_s12, 10 }
  0x5b   : > { %v215_v2 = vld [vmem:[#allocation5 + $0x10] sm:$0xff]  ;;  %v753_v3 = vpack.c.bf16 %v214_v1, %v213_v0  ;;  %v216_v4 = vld [vmem:[#allocation5 + $0x18] sm:$0xff]  ;;  %v217_v6 = vld [vmem:[#allocation5 + $0x20] sm:$0xff]  ;;  %s194_s19 = scalar_lea.vmem [#allocation7], %s578_s17  ;;  %s1241_s5 = scalar_lea.hbm %s1292_s2, %s617_s6 }
  0x5c   : > { %v757_v5 = vpack.c.bf16 %v216_v4, %v215_v2  ;;  %v218_v7 = vld [vmem:[#allocation5 + $0x28] sm:$0xff]  ;;  %v197_v9 = vld [vmem:[%s1208_s29] sm:$0xff]  ;;  %v219_v11 = vld [vmem:[#allocation5 + $0x30] sm:$0xff]  ;;  %s470_s21 = sshll.u32 %s194_s19, 4  ;;  %s455_s12 = scalar_lea.sflag [#allocation4], %s1204_s16  ;;  %s1236_s21 = int_to_ptr.vmem [resolvable:$true] %s470_s21 }
  0x5d   : > { %754 = vmatprep.subr.bf16.mxu0 %v753_v3  ;;  %785 = vmatprep.subr.bf16.mxu1 %v753_v3  ;;  %v761_v8 = vpack.c.bf16 %v218_v7, %v217_v6  ;;  %v205_v10 = vld [vmem:[%s1208_s29 + $0x40] sm:$0xff]  ;;  %v220_v12 = vld [vmem:[#allocation5 + $0x38] sm:$0xff]  ;;  %v222_v15 = vld [vmem:[#allocation5 + $0x48] sm:$0xff]  ;;  %s936_s8 = scalar_lea.vmem %s1236_s21, 1024  ;;  %s1028_s15 = smov [#allocation7]  }
  0x5e   : > { %756 = vmatpush3.bf16.msra.mxu0 %v753_v3  ;;  %793 = vmatpush3.bf16.msra.mxu1 %v753_v3  ;;  %v765_v13 = vpack.c.bf16 %v220_v12, %v219_v11  ;;  %v221_v14 = vld [vmem:[#allocation5 + $0x40] sm:$0xff]  ;;  %v223_v17 = vld [vmem:[#allocation5 + $0x50] sm:$0xff]  ;;  %v224_v18 = vld [vmem:[#allocation5 + $0x58] sm:$0xff]  ;;  %p937_p4 = scmp.ne.s32.totalorder %s1236_s21, %s936_s8  ;;  %s940_s30 = sshll.u32 %s1028_s15, 4  ;;  %s941_s30 = int_to_ptr.vmem [resolvable:$false] %s940_s30 }
  0x5f   : > { %758 = vmatprep.subr.bf16.mxu0 %v757_v5  ;;  %786 = vmatprep.subr.bf16.mxu1 %v757_v5  ;;  %v769_v16 = vpack.c.bf16 %v222_v15, %v221_v14  ;;  %v773_v19 = vpack.c.bf16 %v224_v18, %v223_v17  ;;  %v225_v20 = vld [vmem:[#allocation5 + $0x60] sm:$0xff]  ;;  %v226_v21 = vld [vmem:[#allocation5 + $0x68] sm:$0xff]  ;;  %v227_v23 = vld [vmem:[#allocation5 + $0x70] sm:$0xff]  ;;  %s942_s23 = scalar_lea.vmem %s941_s30, 2048  ;;  %p943_p12 = scmp.lt.s32.totalorder %s1236_s21, %s941_s30 }
  0x60   : > { %729 = vmatprep.mubr.f32.mxu0 %v197_v9  ;;  %741 = vmatprep.mubr.f32.mxu1 %v205_v10  ;;  %v777_v22 = vpack.c.bf16 %v226_v21, %v225_v20  ;;  %v228_v24 = vld [vmem:[#allocation5 + $0x78] sm:$0xff]  ;;  %v198_v26 = vld [vmem:[%s1208_s29 + $0x8] sm:$0xff]  ;;  %v199_v28 = vld [vmem:[%s1208_s29 + $0x10] sm:$0xff]  ;;  %p938_p6 = pnand %p937_p4, %p1145_p10  ;;  %p944_p11 = scmp.lt.s32.totalorder %s942_s23, %s936_s8 }
  0x61   : > { %v781_v25 = vpack.c.bf16 %v228_v24, %v227_v23  ;;  %v206_v27 = vld [vmem:[%s1208_s29 + $0x48] sm:$0xff]  ;;  %v207_v29 = vld [vmem:[%s1208_s29 + $0x50] sm:$0xff]  ;;  %v200_v30 = vld [vmem:[%s1208_s29 + $0x18] sm:$0xff] }
  0x62   : > { %760 = vmatpush3.bf16.msra.mxu0 %v757_v5  ;;  %794 = vmatpush3.bf16.msra.mxu1 %v757_v5  ;;  %v208_v31 = vld [vmem:[%s1208_s29 + $0x58] sm:$0xff]  ;;  %v201_v32 = vld [vmem:[%s1208_s29 + $0x20] sm:$0xff]  ;;  %v202_v34 = vld [vmem:[%s1208_s29 + $0x28] sm:$0xff]  ;;  %p939_p8 = pneg %p938_p6  ;;  %p945_p0 = por %p944_p11, %p943_p12 }
  0x63   : > { %762 = vmatprep.subr.bf16.mxu0 %v761_v8  ;;  %787 = vmatprep.subr.bf16.mxu1 %v761_v8  ;;  %v209_v33 = vld [vmem:[%s1208_s29 + $0x60] sm:$0xff]  ;;  %v210_v35 = vld [vmem:[%s1208_s29 + $0x68] sm:$0xff]  ;;  %v203_v36 = vld [vmem:[%s1208_s29 + $0x30] sm:$0xff] }
  0x64   : > { %v211_v37 = vld [vmem:[%s1208_s29 + $0x70] sm:$0xff]  ;;  %v204_v38 = vld [vmem:[%s1208_s29 + $0x38] sm:$0xff]  ;;  %p946_p5 = pnand %p945_p0, %p939_p8 }
  0x65   : > { %v212_v39 = vld [vmem:[%s1208_s29 + $0x78] sm:$0xff] }
  0x66   : > { %764 = vmatpush3.bf16.msra.mxu0 %v761_v8  ;;  %795 = vmatpush3.bf16.msra.mxu1 %v761_v8 }
  0x67   : > { %766 = vmatprep.subr.bf16.mxu0 %v765_v13  ;;  %788 = vmatprep.subr.bf16.mxu1 %v765_v13 }
  0x6a   : > { %768 = vmatpush3.bf16.msra.mxu0 %v765_v13  ;;  %796 = vmatpush3.bf16.msra.mxu1 %v765_v13 }
  0x6b   : > { %770 = vmatprep.subr.bf16.mxu0 %v769_v16  ;;  %789 = vmatprep.subr.bf16.mxu1 %v769_v16 }
  0x6e   : > { %772 = vmatpush3.bf16.msra.mxu0 %v769_v16  ;;  %797 = vmatpush3.bf16.msra.mxu1 %v769_v16 }
  0x6f   : > { %774 = vmatprep.subr.bf16.mxu0 %v773_v19  ;;  %790 = vmatprep.subr.bf16.mxu1 %v773_v19 }
  0x72   : > { %776 = vmatpush3.bf16.msra.mxu0 %v773_v19  ;;  %798 = vmatpush3.bf16.msra.mxu1 %v773_v19 }
  0x73   : > { %778 = vmatprep.subr.bf16.mxu0 %v777_v22  ;;  %791 = vmatprep.subr.bf16.mxu1 %v777_v22 }
  0x76   : > { %780 = vmatpush3.bf16.msra.mxu0 %v777_v22  ;;  %799 = vmatpush3.bf16.msra.mxu1 %v777_v22 }
  0x77   : > { %782 = vmatprep.subr.bf16.mxu0 %v781_v25  ;;  %792 = vmatprep.subr.bf16.mxu1 %v781_v25 }
  0x7a   : > { %784 = vmatpush3.bf16.msra.mxu0 %v781_v25  ;;  %800 = vmatpush3.bf16.msra.mxu1 %v781_v25 }
  0x7d   : > { %730 = vmatmul.mubr.f32.vlgmr.msra.gmra.mrb[0].mxu0 %v198_v26  ;;  %742 = vmatmul.mubr.f32.vlgmr.msra.gmra.mrb[0].mxu1 %v206_v27 }
  0x7e   : > { %732 = vmatprep.mubr.f32.mxu0 %v199_v28  ;;  %744 = vmatprep.mubr.f32.mxu1 %v207_v29 }
  0x81   : > { %733 = vmatmul.mubr.f32.gmra.mrb[2].mxu0 %v200_v30  ;;  %745 = vmatmul.mubr.f32.gmra.mrb[2].mxu1 %v208_v31 }
  0x82   : > { %735 = vmatprep.mubr.f32.mxu0 %v201_v32  ;;  %747 = vmatprep.mubr.f32.mxu1 %v209_v33 }
  0x85   : > { %736 = vmatmul.mubr.f32.gmra.mrb[4].mxu0 %v202_v34  ;;  %748 = vmatmul.mubr.f32.gmra.mrb[4].mxu1 %v210_v35 }
  0x86   : > { %738 = vmatprep.mubr.f32.mxu0 %v203_v36  ;;  %750 = vmatprep.mubr.f32.mxu1 %v211_v37 }
  0x89   : > { %739 = vmatmul.mubr.f32.gmra.mrb[6].mxu0 %v204_v38  ;;  %751 = vmatmul.mubr.f32.gmra.mrb[6].mxu1 %v212_v39 }
 0x150   : > { %v731_v40 = vpop.f32.mrb[0].mxu0  ;;  %v743_v41 = vpop.f32.mrb[0].mxu1 }
 0x151   : > { %v295_v42 = vpop.f32.mrb[1].mxu0  ;;  %v335_v43 = vpop.f32.mrb[1].mxu1 }
 0x152   : > { %v621_v44 = vpack.c.bf16 %v731_v40, %v295_v42  ;;  %v641_v45 = vpack.c.bf16 %v743_v41, %v335_v43 }
 0x154   : > { %622 = vst [vmem:[%s194_s19] sm:$0xff] %v621_v44   ;;  %661 = vst [vmem:[%s194_s19 + $0x20] sm:$0xff] %v641_v45   ;;  %v734_v46 = vpop.f32.mrb[2].mxu0  ;;  %v746_v47 = vpop.f32.mrb[2].mxu1 }
 0x155   : > { %v305_v48 = vpop.f32.mrb[3].mxu0  ;;  %v345_v49 = vpop.f32.mrb[3].mxu1 }
 0x156   : > { %v626_v50 = vpack.c.bf16 %v734_v46, %v305_v48  ;;  %v646_v51 = vpack.c.bf16 %v746_v47, %v345_v49 }
 0x158   : > { %658 = vst [vmem:[%s194_s19 + $0x8] sm:$0xff] %v626_v50   ;;  %662 = vst [vmem:[%s194_s19 + $0x28] sm:$0xff] %v646_v51   ;;  %v737_v52 = vpop.f32.mrb[4].mxu0  ;;  %v749_v53 = vpop.f32.mrb[4].mxu1 }
 0x159   : > { %v315_v54 = vpop.f32.mrb[5].mxu0  ;;  %v355_v55 = vpop.f32.mrb[5].mxu1 }
 0x15a   : > { %v631_v56 = vpack.c.bf16 %v737_v52, %v315_v54  ;;  %v651_v57 = vpack.c.bf16 %v749_v53, %v355_v55 }
 0x15c   : > { %659 = vst [vmem:[%s194_s19 + $0x10] sm:$0xff] %v631_v56   ;;  %663 = vst [vmem:[%s194_s19 + $0x30] sm:$0xff] %v651_v57   ;;  %v740_v58 = vpop.f32.mrb[6].mxu0  ;;  %v752_v59 = vpop.f32.mrb[6].mxu1 }
 0x15d   : > { %v325_v60 = vpop.f32.mrb[7].mxu0  ;;  %v365_v61 = vpop.f32.mrb[7].mxu1 }
 0x15e   : > { %v636_v62 = vpack.c.bf16 %v740_v58, %v325_v60  ;;  %v656_v63 = vpack.c.bf16 %v752_v59, %v365_v61 }
 0x160   : > { %660 = vst [vmem:[%s194_s19 + $0x18] sm:$0xff] %v636_v62   ;;  %664 = vst [vmem:[%s194_s19 + $0x38] sm:$0xff] %v656_v63  }
 0x161   : > { %949 = shalt.err (!%p946_p5)
}
 0x162   : > { %s950_s3 = scalar_lea.hbm %s1241_s5, 1024  ;;  %s954_s27 = scalar_lea.hbm %s1292_s2, 2048 }
 0x163   : > { %p951_p9 = scmp.ne.s32.totalorder %s1241_s5, %s950_s3  ;;  %p955_p3 = scmp.lt.u32.totalorder %s1241_s5, %s1292_s2 }
 0x164   : > { %p956_p7 = scmp.lt.u32.totalorder %s954_s27, %s950_s3  ;;  %p958_p4 = scmp.lt.u32.totalorder %s950_s3, %s1241_s5 }
 0x165   : > { %p952_p1 = pnand %p951_p9, %p1145_p10 }
 0x166   : > { %p957_p13 = por %p956_p7, %p955_p3 }
 0x167   : > { %p953_p2 = pneg %p952_p1 }
 0x168   : > { %p959_p6 = por %p958_p4, %p957_p13 }
 0x16a   : > { %p960_p8 = pnand %p959_p6, %p953_p2 }
 0x16c   : > { %963 = shalt.err (!%p960_p8)
}
 0x16d   : > { %s1029_s17 = smov 64   ;;  %s1030_s19 = smov 4  }
 0x16e   : > { %807 = dma.vmem_to_hbm [thread:$0]  (%p1145_p10), %s1236_s21, 1024, %s1241_s5, %s455_s12, %s1029_s17, %s1029_s17, %s1030_s19  }
 0x16f PF: > { %s485_s6 = sand.u32 1, %s1002_s9   ;;  %p1310_p12 = scmp.ne.s32.totalorder %s1300_s20, 0 }
 0x170   : > { %p1311_p11 = scmp.ge.s32.totalorder %s1022_s14, 2  ;;  %s486_s7 = scalar_lea.sflag [#allocation4], %s485_s6 }
 0x172   : > { %p818_p0 = pnand %p1311_p11, %p1310_p12 }
 0x174   : > { %997 = dma.done.wait (!%p818_p0), %s486_s7, 1024  }
 0x175   : > { %999 = vsyncadd (!%p818_p0), %s486_s7, 4294966272  ;;  %s19_s14 = sadd.s32 1, %s1022_s14   ;;  %s1312_s9 = smov %s1006_s10 }
 0x176   : > { %p16_p5 = scmp.ge.s32.totalorder %s19_s14, 4   ;;  %s1313_s10 = smov %s1010_s11 }
 0x177   : > { %s1314_s11 = smov %s1154_s28  ;;  %s1315_s12 = smov %s1018_s13 }
 0x178   : > { %s1316_s13 = smov %s1318_s25  ;;  %18 = sbr.rel (!%p16_p5) target bundleno = 7 (0x7), region = 77 }
 0x17f   :  { %491 = vsyncpa [#allocation3], 1 }
 0x180   :  { %493 = vsyncpa [#allocation3 + $0x1], 1 }
 0x181   :  { %494 = vsyncpa [#allocation6], 1 }
 0x182   :  { %495 = vsyncpa [#allocation4], 1 }
 0x183   :  { %497 = vsyncpa [#allocation4 + $0x1], 1 }

</bundles_post_ra>
